<compile_context>
chip_gen: v7x
topology: tpu7x:2x2x1
jax: 0.10.0
libtpu: 0.0.40
codegen_flags: <defaults>
</compile_context>

<pallas_src>
import jax
import jax.numpy as jnp
from jax.experimental import pallas as pl
from jax.experimental.pallas import tpu as pltpu

HIDDEN = 32
EMBED_DIM = 2 * HIDDEN          # forward() takes the cell state from h[0, H:embed_dim]
ITEMNUM = 100                   # vocab / output size
K_FUSED = 128                   # EMBED_DIM + HIDDEN + 1 (bias lane) + pad -> one MXU K tile
PAD = K_FUSED - EMBED_DIM - HIDDEN - 1   # = 31 zero rows / lanes


def lstm_cell_kernel(row_ref, c_ref, w_ref, hc_out_ref):
    """Fused single LSTM-cell step.

    row_ref : (1, 128)  = [x_emb(64) | h(32) | 1.0 | zeros(31)]
    c_ref   : (1, H)    previous cell state
    w_ref   : (128, 4H) = [W_ih^T ; W_hh^T ; (b_ih+b_hh) ; zeros]
    hc_out  : (1, 2H)   packed [h_new | c_new]
    Gate order along the 4H lane axis matches PyTorch nn.LSTM: (i, f, g, o).
    """
    H = c_ref.shape[1]
    # Single MXU pass: gates = x@W_ih^T + h@W_hh^T + (b_ih + b_hh)
    gates = jnp.dot(row_ref[...], w_ref[...], preferred_element_type=jnp.float32)

    # Two full-vreg EUP dispatches, then lane slices.
    sig = jax.nn.sigmoid(gates)
    th = jnp.tanh(gates)
    i = sig[:, 0 * H:1 * H]
    f = sig[:, 1 * H:2 * H]
    g = th[:, 2 * H:3 * H]
    o = sig[:, 3 * H:4 * H]

    c_new = f * c_ref[...] + i * g
    h_new = o * jnp.tanh(c_new)

    # Single packed [h | c] output slab.
    hc_out_ref[:, 0:H] = h_new
    hc_out_ref[:, H:2 * H] = c_new


def lstm_cell_fused(row, cell, w_fused):
    """One pallas_call, no grid (one-shot kernel), all operands VMEM-resident."""
    H = cell.shape[1]
    return pl.pallas_call(
        lstm_cell_kernel,
        out_shape=jax.ShapeDtypeStruct((1, 2 * H), jnp.float32),
        in_specs=[
            pl.BlockSpec(memory_space=pltpu.MemorySpace.VMEM),   # fused input row
            pl.BlockSpec(memory_space=pltpu.MemorySpace.VMEM),   # cell state
            pl.BlockSpec(memory_space=pltpu.MemorySpace.VMEM),   # fused weights
        ],
        out_specs=pl.BlockSpec(memory_space=pltpu.MemorySpace.VMEM),
    )(row, cell, w_fused)


def init_params(key):
    """Deterministic synthetic parameters matching nn.LSTM / nn.Linear / embed shapes."""
    k1, k2, k3, k4, k5, k6 = jax.random.split(key, 6)
    scale = 1.0 / jnp.sqrt(HIDDEN)
    w_ih = jax.random.uniform(k1, (4 * HIDDEN, EMBED_DIM), jnp.float32, -scale, scale)
    w_hh = jax.random.uniform(k2, (4 * HIDDEN, HIDDEN), jnp.float32, -scale, scale)
    b_ih = jax.random.uniform(k3, (4 * HIDDEN,), jnp.float32, -scale, scale)
    b_hh = jax.random.uniform(k4, (4 * HIDDEN,), jnp.float32, -scale, scale)
    embed = jax.random.normal(k5, (ITEMNUM, EMBED_DIM), jnp.float32)
    # self.label (nn.Linear(H, itemnum)) exists in __init__ but is never used in forward().
    w_label = jax.random.uniform(k6, (ITEMNUM, HIDDEN), jnp.float32, -scale, scale)

    # Pre-stacked fused weight: [W_ih^T ; W_hh^T ; b_ih+b_hh ; zero pad] -> (128, 4H).
    w_fused = jnp.zeros((K_FUSED, 4 * HIDDEN), jnp.float32)
    w_fused = w_fused.at[0:EMBED_DIM, :].set(w_ih.T)
    w_fused = w_fused.at[EMBED_DIM:EMBED_DIM + HIDDEN, :].set(w_hh.T)
    w_fused = w_fused.at[EMBED_DIM + HIDDEN, :].set(b_ih + b_hh)

    return {
        "w_fused": w_fused,        # (128, 4H) kernel operand
        "embed": embed,            # (itemnum, E)
        "w_label": w_label,        # unused, mirrors module
        # raw copies kept only for the pure-JAX reference check below
        "w_ih": w_ih, "w_hh": w_hh, "b_ih": b_ih, "b_hh": b_hh,
    }


def lstm_classifier_forward(params, hc, x):
    """Mirrors LSTMClassifier.forward(hc, x) -> (out, (h_n, c_n))."""
    h = hc[0]                                   # (1, embed_dim)
    hidden = h[:, 0:HIDDEN]                     # (1, H)
    cell = h[:, HIDDEN:EMBED_DIM]               # (1, H)

    x_idx = jnp.asarray(x, jnp.int32)
    x_emb = jnp.take(params["embed"], x_idx, axis=0)[None, :]   # (1, E) embedding lookup (glue)

    # Fused (1, 128) input row: [x_emb | h | 1.0 | zeros]  (bias folded via the 1.0 lane).
    row = jnp.concatenate(
        [x_emb, hidden,
         jnp.ones((1, 1), jnp.float32),
         jnp.zeros((1, PAD), jnp.float32)], axis=1)

    hc_new = lstm_cell_fused(row, cell, params["w_fused"])      # (1, 2H) = [h_new | c_new]
    h1 = hc_new[:, 0:HIDDEN]
    c1 = hc_new[:, HIDDEN:2 * HIDDEN]

    out = h1[None, :, :]                         # (1, 1, H) batch_first output, seq_len=1
    hidden2 = (h1[None, :, :], c1[None, :, :])   # each (1, 1, H)
    return out, hidden2


def _reference_forward(params, hc, x):
    """Pure-JAX nn.LSTM single-step reference for correctness checking."""
    h = hc[0]
    h0 = h[:, 0:HIDDEN]
    c0 = h[:, HIDDEN:EMBED_DIM]
    x_emb = params["embed"][x][None, :]
    gates = (x_emb @ params["w_ih"].T + h0 @ params["w_hh"].T
             + (params["b_ih"] + params["b_hh"])[None, :])
    H = HIDDEN
    i = jax.nn.sigmoid(gates[:, 0 * H:1 * H])
    f = jax.nn.sigmoid(gates[:, 1 * H:2 * H])
    g = jnp.tanh(gates[:, 2 * H:3 * H])
    o = jax.nn.sigmoid(gates[:, 3 * H:4 * H])
    c1 = f * c0 + i * g
    h1 = o * jnp.tanh(c1)
    return h1, c1


if __name__ == "__main__":
    root = jax.random.PRNGKey(0)
    pkey, hkey = jax.random.split(root)
    params = init_params(pkey)

    # hc[0] : (1, embed_dim) state vector whose first half is h0, second half is c0
    h_state = jax.random.normal(hkey, (1, EMBED_DIM), jnp.float32)
    hc = (h_state,)
    x = jnp.int32(7)   # token index (traced int32, matches torch.LongTensor([x]))

    fwd = jax.jit(lstm_classifier_forward)
    out, (h_n, c_n) = fwd(params, hc, x)
    jax.block_until_ready((out, h_n, c_n))

    assert out.shape == (1, 1, HIDDEN)
    assert h_n.shape == (1, 1, HIDDEN) and c_n.shape == (1, 1, HIDDEN)

    # Numerical check against a pure-JAX reference of the PyTorch semantics.
    h_ref, c_ref = _reference_forward(params, hc, 7)
    assert jnp.allclose(h_n[0], h_ref, atol=1e-5, rtol=1e-5)
    assert jnp.allclose(c_n[0], c_ref, atol=1e-5, rtol=1e-5)

    print("KERNEL_OK")
</pallas_src>

<mosaic_0001>
module attributes {stable_mosaic.version = 11 : i64} {
  func.func @lstm_cell_kernel(%arg0: memref<1x128xf32, #tpu.memory_space<vmem>>, %arg1: memref<1x32xf32, #tpu.memory_space<vmem>>, %arg2: memref<128x128xf32, #tpu.memory_space<vmem>>, %arg3: memref<1x64xf32, #tpu.memory_space<vmem>>) attributes {dimension_semantics = [], scalar_prefetch = 0 : i64, scratch_operands = 0 : i64, tpu.core_type = #tpu.core_type<tc>} {
    %c0 = arith.constant 0 : index
    %c0_0 = arith.constant 0 : index
    %0 = vector.load %arg0[%c0, %c0_0] : memref<1x128xf32, #tpu.memory_space<vmem>>, vector<1x128xf32>
    %c0_1 = arith.constant 0 : index
    %c0_2 = arith.constant 0 : index
    %1 = vector.load %arg2[%c0_1, %c0_2] : memref<128x128xf32, #tpu.memory_space<vmem>>, vector<128x128xf32>
    %cst = arith.constant dense<0.000000e+00> : vector<1x128xf32>
    %2 = tpu.matmul %0, %1, %cst {dimension_numbers = #tpu.dot_dimension_numbers<[1], [0], [0], [1], [0, 0, 1, 1], [], []>} : vector<1x128xf32>, vector<128x128xf32>, vector<1x128xf32> -> vector<1x128xf32>
    %3 = arith.negf %2 : vector<1x128xf32>
    %4 = math.exp %3 : vector<1x128xf32>
    %cst_3 = arith.constant 1.000000e+00 : f32
    %5 = vector.broadcast %cst_3 : f32 to vector<1x128xf32>
    %6 = arith.addf %5, %4 : vector<1x128xf32>
    %7 = arith.divf %5, %6 : vector<1x128xf32>
    %8 = math.tanh %2 : vector<1x128xf32>
    %9 = vector.extract_strided_slice %7 {offsets = [0, 0], sizes = [1, 32], strides = [1, 1]} : vector<1x128xf32> to vector<1x32xf32>
    %10 = vector.extract_strided_slice %7 {offsets = [0, 32], sizes = [1, 32], strides = [1, 1]} : vector<1x128xf32> to vector<1x32xf32>
    %11 = vector.extract_strided_slice %8 {offsets = [0, 64], sizes = [1, 32], strides = [1, 1]} : vector<1x128xf32> to vector<1x32xf32>
    %12 = vector.extract_strided_slice %7 {offsets = [0, 96], sizes = [1, 32], strides = [1, 1]} : vector<1x128xf32> to vector<1x32xf32>
    %c0_4 = arith.constant 0 : index
    %c0_5 = arith.constant 0 : index
    %13 = vector.load %arg1[%c0_4, %c0_5] : memref<1x32xf32, #tpu.memory_space<vmem>>, vector<1x32xf32>
    %14 = arith.mulf %10, %13 : vector<1x32xf32>
    %15 = arith.mulf %9, %11 : vector<1x32xf32>
    %16 = arith.addf %14, %15 : vector<1x32xf32>
    %17 = math.tanh %16 : vector<1x32xf32>
    %18 = arith.mulf %12, %17 : vector<1x32xf32>
    %c0_6 = arith.constant 0 : index
    %c0_7 = arith.constant 0 : index
    %19 = vector.load %arg3[%c0_6, %c0_7] : memref<1x64xf32, #tpu.memory_space<vmem>>, vector<1x32xf32>
    tpu.vector_store %arg3[%c0_6, %c0_7], %18 {strides = array<i32>} : memref<1x64xf32, #tpu.memory_space<vmem>>, vector<1x32xf32>,
    %c0_8 = arith.constant 0 : index
    %c32 = arith.constant 32 : index
    %20 = vector.load %arg3[%c0_8, %c32] : memref<1x64xf32, #tpu.memory_space<vmem>>, vector<1x32xf32>
    tpu.vector_store %arg3[%c0_8, %c32], %16 {strides = array<i32>} : memref<1x64xf32, #tpu.memory_space<vmem>>, vector<1x32xf32>,
    return
  }
}

</mosaic_0001>

<bundles_post_ra>
// kernel: lstm_classifier_forward.1
= control target key start
LH: loop header
LB: loop body
LE: loop exit
PB: predicated region body
PF: predicated region fallthrough
CT: control target
= control target key end

     0   :  { %v237_v0 = vmov 0.0|0.0   ;;  %vm238_vm0 = vmmov 0   ;;  %v239_v4 = vmov 0.0   ;;  %s240_s19 = smov 64   ;;  %vm138_vm1 = vcmask 253952   ;;  %s322_s2 = inlined_call_operand.vmem [shape: f32[128,128], index: 2, kind: input, shape index: {}]   ;;  %s323_s0 = inlined_call_operand.vmem [shape: f32[1,128], index: 0, kind: input, shape index: {}]   ;;  %s324_s1 = inlined_call_operand.vmem [shape: f32[1,32], index: 1, kind: input, shape index: {}]   ;;  %s325_s3 = inlined_call_operand.vmem [shape: f32[1,64], index: 3, kind: output, shape index: {}]  }
   0x1   :  { %200 = vmatprep.subr.bf16.mxu0 %v237_v0  ;;  %v15_v1 = vld [vmem:[%s322_s2] sm:$0xff]  ;;  %v16_v2 = vld [vmem:[%s322_s2 + $0x8] sm:$0xff]  ;;  %v17_v3 = vld [vmem:[%s322_s2 + $0x10] sm:$0xff]  ;;  %197 = vmatprep.mubr.msk.f32.mxu0 %vm238_vm0, %v239_v4  ;;  %vm140_vm2 = vcmask 516352  }
   0x2   :  { %v201_v5 = vpack.c.bf16 %v16_v2, %v15_v1  ;;  %v18_v6 = vld [vmem:[%s322_s2 + $0x18] sm:$0xff]  ;;  %v19_v8 = vld [vmem:[%s322_s2 + $0x20] sm:$0xff]  ;;  %v20_v9 = vld [vmem:[%s322_s2 + $0x28] sm:$0xff] }
   0x3   :  { %v204_v7 = vpack.c.bf16 %v18_v6, %v17_v3  ;;  %v207_v10 = vpack.c.bf16 %v20_v9, %v19_v8  ;;  %v21_v11 = vld [vmem:[%s322_s2 + $0x30] sm:$0xff]  ;;  %v22_v12 = vld [vmem:[%s322_s2 + $0x38] sm:$0xff]  ;;  %v23_v14 = vld [vmem:[%s322_s2 + $0x40] sm:$0xff] }
   0x4   :  { %202 = vmatpush3.bf16.msra.mxu0 %v201_v5  ;;  %v210_v13 = vpack.c.bf16 %v22_v12, %v21_v11  ;;  %v24_v15 = vld [vmem:[%s322_s2 + $0x48] sm:$0xff]  ;;  %v25_v17 = vld [vmem:[%s322_s2 + $0x50] sm:$0xff]  ;;  %v26_v18 = vld [vmem:[%s322_s2 + $0x58] sm:$0xff] }
   0x5   :  { %203 = vmatprep.subr.bf16.mxu0 %v237_v0  ;;  %v213_v16 = vpack.c.bf16 %v24_v15, %v23_v14  ;;  %v216_v19 = vpack.c.bf16 %v26_v18, %v25_v17  ;;  %v27_v20 = vld [vmem:[%s322_s2 + $0x60] sm:$0xff]  ;;  %v28_v21 = vld [vmem:[%s322_s2 + $0x68] sm:$0xff]  ;;  %v29_v23 = vld [vmem:[%s322_s2 + $0x70] sm:$0xff] }
   0x6   :  { %v219_v22 = vpack.c.bf16 %v28_v21, %v27_v20  ;;  %v30_v24 = vld [vmem:[%s322_s2 + $0x78] sm:$0xff]  ;;  %v14_v26 = vld [vmem:[%s323_s0] sm:$0x1]  ;;  %s241_s2 = smov 32  }
   0x7   :  { %v222_v25 = vpack.c.bf16 %v30_v24, %v29_v23  ;;  %v147_v30 = vld [vmem:[%s324_s1] ss:$0 sm:$0xff] }
   0x8   :  { %205 = vmatpush3.bf16.msra.mxu0 %v204_v7 }
   0x9   :  { %206 = vmatprep.subr.bf16.mxu0 %v237_v0 }
   0xc   :  { %208 = vmatpush3.bf16.msra.mxu0 %v207_v10 }
   0xd   :  { %209 = vmatprep.subr.bf16.mxu0 %v237_v0 }
  0x10   :  { %211 = vmatpush3.bf16.msra.mxu0 %v210_v13 }
  0x11   :  { %212 = vmatprep.subr.bf16.mxu0 %v237_v0 }
  0x14   :  { %214 = vmatpush3.bf16.msra.mxu0 %v213_v16 }
  0x15   :  { %215 = vmatprep.subr.bf16.mxu0 %v237_v0 }
  0x18   :  { %217 = vmatpush3.bf16.msra.mxu0 %v216_v19 }
  0x19   :  { %218 = vmatprep.subr.bf16.mxu0 %v237_v0 }
  0x1c   :  { %220 = vmatpush3.bf16.msra.mxu0 %v219_v22 }
  0x1d   :  { %221 = vmatprep.subr.bf16.mxu0 %v237_v0 }
  0x20   :  { %223 = vmatpush3.bf16.msra.mxu0 %v222_v25 }
  0x23   :  { %198 = vmatmul.mubr.f32.vlgmr.msra.gmra.mrb[0].mxu0 %v14_v26 }
  0xf6   :  { %v97_v27 = vpop.f32.mrb[0].mxu0 }
  0xf7   :  { %229 = vtanh.f32 %v97_v27  ;;  %v199_v28 = vpop.f32.mrb[1].mxu0  ;;  %v146_v31 = vmul.f32 -1.442695, %v97_v27 }
  0xf9   :  { %231 = vpow2.f32 %v146_v31 }
 0x101   :  { %v230_v29 = vpop.eup %229 }
 0x102   :  { %119 = vrot.lane.b32.xlu0 %v230_v29, %s240_s19 }
 0x103   :  { %v232_v32 = vpop.eup %231 }
 0x104   :  { %v104_v33 = vadd.f32 1.0, %v232_v32 }
 0x106   :  { %114 = vrot.lane.b32.xlu0 %v147_v30, %s241_s2  ;;  %233 = vrcp.f32 %v104_v33 }
 0x110   :  { %v234_v34 = vpop.eup %233 }
 0x174   :  { %v120_v35 = vpop.permute.xlu0 %119 }
 0x175   :  { %v122_v36 = vmul.f32 %v234_v34, %v120_v35 }
 0x177   :  { %124 = vrot.lane.b32.xlu1 %v122_v36, %s241_s2 }
 0x178   :  { %v115_v37 = vpop.permute.xlu0 %114 }
 0x179   :  { %v117_v38 = vmul.f32 %v234_v34, %v115_v37 }
 0x1e9   :  { %v125_v39 = vpop.permute.xlu1 %124 }
 0x1ea   :  { %v127_v40 = vadd.f32 %v125_v39, %v117_v38 }
 0x1ec   :  { %235 = vtanh.f32 %v127_v40 }
 0x1f6   :  { %v236_v41 = vpop.eup %235 }
 0x1f7   :  { %130 = vrot.lane.b32.xlu1 %v236_v41, %s240_s19 }
 0x269   :  { %v131_v42 = vpop.permute.xlu1 %130 }
 0x26a   :  { %v133_v43 = vmul.f32 %v234_v34, %v131_v42 }
 0x26c   :  { %135 = vrot.lane.b32.xlu0 %v133_v43, %s241_s2 }
 0x2de   :  { %v136_v44 = vpop.permute.xlu0 %135 }
 0x2df   :  { %139 = vst.msk [vmem:[%s325_s3] sm:$0x1] %vm138_vm1, %v136_v44 }
 0x2e0   :  { %141 = vst.msk [vmem:[%s325_s3] sm:$0x1] %vm140_vm2, %v127_v40 }

</bundles_post_ra>
